<compile_context>
chip_gen: v6e
topology: v6e:2x2x1
jax: 0.10.0
libtpu: 0.0.40
codegen_flags: <defaults>
</compile_context>

<pallas_src>
import math

import jax
import jax.numpy as jnp
from jax.experimental import pallas as pl
from jax.experimental.pallas import tpu as pltpu


# ----------------------------------------------------------------------------- helpers
def _round_up(n, m):
    return ((n + m - 1) // m) * m


def _pad2(a, rows, cols):
    r, c = a.shape
    return jnp.pad(a, ((0, rows - r), (0, cols - c)))


# ----------------------------------------------------------------------------- kernels
def _make_train_kernel(use_bf16):
    def kernel(x_ref, wmu_ref, wsig_ref, eps_in_ref, eps_out_ref,
               bmu_ref, bsig_ref, o_ref):
        # Compose the noisy weight tile from rank-1 factorized noise.
        # VPU work that hides under the weight-stream DMA; kept in f32
        # (v5e VPU has no bf16) — only the MXU operands get cast.
        w = wmu_ref[...] + wsig_ref[...] * (eps_in_ref[...] * eps_out_ref[...])   # (In, tn)
        b = bmu_ref[...] + bsig_ref[...] * eps_out_ref[...]                        # (1, tn)
        x = x_ref[...]                                                             # (B, In)
        if use_bf16:
            x = x.astype(jnp.bfloat16)
            w = w.astype(jnp.bfloat16)
        y = jnp.dot(x, w, preferred_element_type=jnp.float32)                      # (B, tn)
        o_ref[...] = (y + b).astype(o_ref.dtype)
    return kernel


def _make_eval_kernel(use_bf16):
    def kernel(x_ref, wmu_ref, bmu_ref, o_ref):
        x = x_ref[...]
        w = wmu_ref[...]
        if use_bf16:
            x = x.astype(jnp.bfloat16)
            w = w.astype(jnp.bfloat16)
        y = jnp.dot(x, w, preferred_element_type=jnp.float32)
        o_ref[...] = (y + bmu_ref[...]).astype(o_ref.dtype)
    return kernel


# ----------------------------------------------------------------------------- wrapper
def noisy_linear(x, params, *, training=True, use_bf16_matmul=True):
    """Pallas-backed NoisyLinear forward.

    x: (B, in_features) f32.
    params: dict from init_noisy_linear_params()[0] (padded, (In,Out)-layout).
    """
    in_f = params["in_features"]
    out_f = params["out_features"]
    B, x_in = x.shape
    assert x_in == in_f, "input feature mismatch"

    in_pad, out_pad = params["weight_mu_t"].shape
    b_pad = _round_up(max(B, 1), 8)

    # Pad x (zeros contribute nothing to the contraction).
    x_pad = jnp.pad(x, ((0, b_pad - B), (0, in_pad - in_f)))

    # Out-tile size: lane-dense multiple of 128.
    tn = 256 if out_pad % 256 == 0 else 128
    grid = (out_pad // tn,)

    if training:
        kernel = _make_train_kernel(use_bf16_matmul)
        operands = (x_pad,
                    params["weight_mu_t"], params["weight_sigma_t"],
                    params["eps_in"], params["eps_out"],
                    params["bias_mu"], params["bias_sigma"])
        in_specs = [
            pl.BlockSpec((b_pad, in_pad), lambda j: (0, 0)),   # x (resident)
            pl.BlockSpec((in_pad, tn), lambda j: (0, j)),      # weight_mu  (In, Out)
            pl.BlockSpec((in_pad, tn), lambda j: (0, j)),      # weight_sigma
            pl.BlockSpec((in_pad, 1), lambda j: (0, 0)),       # eps_in  (In, 1)
            pl.BlockSpec((1, tn), lambda j: (0, j)),           # eps_out (1, Out)
            pl.BlockSpec((1, tn), lambda j: (0, j)),           # bias_mu
            pl.BlockSpec((1, tn), lambda j: (0, j)),           # bias_sigma
        ]
    else:
        # Specialized eval path: only mu params are streamed.
        kernel = _make_eval_kernel(use_bf16_matmul)
        operands = (x_pad, params["weight_mu_t"], params["bias_mu"])
        in_specs = [
            pl.BlockSpec((b_pad, in_pad), lambda j: (0, 0)),
            pl.BlockSpec((in_pad, tn), lambda j: (0, j)),
            pl.BlockSpec((1, tn), lambda j: (0, j)),
        ]

    bytes_accessed = sum(int(a.size) * a.dtype.itemsize for a in operands)
    bytes_accessed += b_pad * out_pad * jnp.dtype(x.dtype).itemsize
    cost = pl.CostEstimate(flops=2 * b_pad * in_pad * out_pad,
                           transcendentals=0,
                           bytes_accessed=int(bytes_accessed))

    y_pad = pl.pallas_call(
        kernel,
        out_shape=jax.ShapeDtypeStruct((b_pad, out_pad), x.dtype),
        grid_spec=pltpu.PrefetchScalarGridSpec(
            num_scalar_prefetch=0,
            grid=grid,
            in_specs=in_specs,
            out_specs=pl.BlockSpec((b_pad, tn), lambda j: (0, j)),
        ),
        compiler_params=pltpu.CompilerParams(
            dimension_semantics=("parallel",)),
        cost_estimate=cost,
    )(*operands)

    return y_pad[:B, :out_f]


# ----------------------------------------------------------------------------- params
def prepare_noisy_linear_params(raw):
    """Transpose to (In, Out) layout and pad to TPU-friendly shapes (done ONCE)."""
    out_f, in_f = raw["weight_mu"].shape
    in_pad = _round_up(in_f, 128)
    out_pad = _round_up(out_f, 128)
    return dict(
        weight_mu_t=_pad2(raw["weight_mu"].T, in_pad, out_pad),
        weight_sigma_t=_pad2(raw["weight_sigma"].T, in_pad, out_pad),
        eps_in=_pad2(raw["eps_in"].reshape(in_f, 1), in_pad, 1),
        eps_out=_pad2(raw["eps_out"].reshape(1, out_f), 1, out_pad),
        bias_mu=_pad2(raw["bias_mu"].reshape(1, out_f), 1, out_pad),
        bias_sigma=_pad2(raw["bias_sigma"].reshape(1, out_f), 1, out_pad),
        in_features=in_f,
        out_features=out_f,
    )


def init_noisy_linear_params(key, in_features, out_features, std_init=0.5):
    """Deterministic re-implementation of reset_parameters() + reset_noise()."""
    k1, k2, k3, k4 = jax.random.split(key, 4)
    bound = 1.0 / math.sqrt(in_features)

    weight_mu = jax.random.uniform(
        k1, (out_features, in_features), jnp.float32, minval=-bound, maxval=bound)
    bias_mu = jax.random.uniform(
        k2, (out_features,), jnp.float32, minval=-bound, maxval=bound)
    weight_sigma = jnp.full((out_features, in_features),
                            std_init / math.sqrt(in_features), jnp.float32)
    bias_sigma = jnp.full((out_features,),
                          std_init / math.sqrt(out_features), jnp.float32)

    # Factorized noise: eps = sign(n1) * sqrt(|n2|); weight_epsilon = eps_out ⊗ eps_in.
    n_in = jax.random.normal(k3, (2, in_features), jnp.float32)
    n_out = jax.random.normal(k4, (2, out_features), jnp.float32)
    eps_in = jnp.sign(n_in[0]) * jnp.sqrt(jnp.abs(n_in[1]))
    eps_out = jnp.sign(n_out[0]) * jnp.sqrt(jnp.abs(n_out[1]))

    raw = dict(weight_mu=weight_mu, weight_sigma=weight_sigma,
               bias_mu=bias_mu, bias_sigma=bias_sigma,
               eps_in=eps_in, eps_out=eps_out)
    return prepare_noisy_linear_params(raw), raw


# ----------------------------------------------------------------------------- main
if __name__ == "__main__":
    key = jax.random.PRNGKey(0)
    kx, kp = jax.random.split(key)

    batch, in_features, out_features = 2, 32, 64
    x = jax.random.normal(kx, (batch, in_features), jnp.float32)
    params, raw = init_noisy_linear_params(kp, in_features, out_features, std_init=0.5)

    # Pure-JAX references (PyTorch semantics).
    w_ref = raw["weight_mu"] + raw["weight_sigma"] * jnp.outer(raw["eps_out"], raw["eps_in"])
    b_ref = raw["bias_mu"] + raw["bias_sigma"] * raw["eps_out"]
    y_ref_f32 = x @ w_ref.T + b_ref
    y_ref_bf16 = (jnp.dot(x.astype(jnp.bfloat16), w_ref.T.astype(jnp.bfloat16),
                          preferred_element_type=jnp.float32) + b_ref)

    # --- training mode, default bf16 MXU operands ---
    y = noisy_linear(x, params, training=True)
    jax.block_until_ready(y)
    assert y.shape == (batch, out_features)
    assert jnp.allclose(y, y_ref_bf16, atol=1e-4, rtol=1e-4), "train mismatch (bf16 ref)"
    assert jnp.allclose(y, y_ref_f32, atol=5e-2, rtol=5e-2), "train mismatch (f32 ref)"

    # --- training mode, full-f32 MXU path ---
    y32 = noisy_linear(x, params, training=True, use_bf16_matmul=False)
    jax.block_until_ready(y32)
    y_ref_hi = jnp.dot(x, w_ref.T, precision=jax.lax.Precision.HIGHEST) + b_ref
    assert jnp.allclose(y32, y_ref_hi, atol=5e-3, rtol=5e-3), "train mismatch (f32 path)"

    # --- eval mode (specialized 3-operand kernel, no noise) ---
    y_eval = noisy_linear(x, params, training=False)
    jax.block_until_ready(y_eval)
    y_eval_bf16 = (jnp.dot(x.astype(jnp.bfloat16), raw["weight_mu"].T.astype(jnp.bfloat16),
                           preferred_element_type=jnp.float32) + raw["bias_mu"])
    y_eval_f32 = x @ raw["weight_mu"].T + raw["bias_mu"]
    assert jnp.allclose(y_eval, y_eval_bf16, atol=1e-4, rtol=1e-4), "eval mismatch (bf16 ref)"
    assert jnp.allclose(y_eval, y_eval_f32, atol=5e-2, rtol=5e-2), "eval mismatch (f32 ref)"

    print("KERNEL_OK")
</pallas_src>

<mosaic_0001>
module attributes {stable_mosaic.version = 11 : i64} {
  func.func @kernel(%arg0: i32, %arg1: memref<8x128xf32, #tpu.memory_space<vmem>>, %arg2: memref<128x128xf32, #tpu.memory_space<vmem>>, %arg3: memref<128x128xf32, #tpu.memory_space<vmem>>, %arg4: memref<128x1xf32, #tpu.memory_space<vmem>>, %arg5: memref<1x128xf32, #tpu.memory_space<vmem>>, %arg6: memref<1x128xf32, #tpu.memory_space<vmem>>, %arg7: memref<1x128xf32, #tpu.memory_space<vmem>>, %arg8: memref<8x128xf32, #tpu.memory_space<vmem>>) attributes {dimension_semantics = [#tpu.dimension_semantics<parallel>], iteration_bounds = array<i64: 1>, scalar_prefetch = 0 : i64, scratch_operands = 0 : i64, tpu.core_type = #tpu.core_type<tc>, window_params = [{pipeline_mode = #tpu.pipeline_mode<synchronous>, transform_indices = @transform_0, window_bounds = array<i64: 8, 128>}, {transform_indices = @transform_1, window_bounds = array<i64: 128, 128>}, {transform_indices = @transform_2, window_bounds = array<i64: 128, 128>}, {pipeline_mode = #tpu.pipeline_mode<synchronous>, transform_indices = @transform_3, window_bounds = array<i64: 128, 1>}, {transform_indices = @transform_4, window_bounds = array<i64: 1, 128>}, {transform_indices = @transform_5, window_bounds = array<i64: 1, 128>}, {transform_indices = @transform_6, window_bounds = array<i64: 1, 128>}, {transform_indices = @transform_7, window_bounds = array<i64: 8, 128>}]} {
    %c0 = arith.constant 0 : index
    %c0_0 = arith.constant 0 : index
    %0 = vector.load %arg2[%c0, %c0_0] : memref<128x128xf32, #tpu.memory_space<vmem>>, vector<128x128xf32>
    %c0_1 = arith.constant 0 : index
    %c0_2 = arith.constant 0 : index
    %1 = vector.load %arg3[%c0_1, %c0_2] : memref<128x128xf32, #tpu.memory_space<vmem>>, vector<128x128xf32>
    %c0_3 = arith.constant 0 : index
    %c0_4 = arith.constant 0 : index
    %2 = vector.load %arg4[%c0_3, %c0_4] : memref<128x1xf32, #tpu.memory_space<vmem>>, vector<128x1xf32>
    %c0_5 = arith.constant 0 : index
    %c0_6 = arith.constant 0 : index
    %3 = vector.load %arg5[%c0_5, %c0_6] : memref<1x128xf32, #tpu.memory_space<vmem>>, vector<1x128xf32>
    %4 = vector.broadcast %2 : vector<128x1xf32> to vector<128x128xf32>
    %5 = vector.broadcast %3 : vector<1x128xf32> to vector<128x128xf32>
    %6 = arith.mulf %4, %5 : vector<128x128xf32>
    %7 = arith.mulf %1, %6 : vector<128x128xf32>
    %8 = arith.addf %0, %7 : vector<128x128xf32>
    %c0_7 = arith.constant 0 : index
    %c0_8 = arith.constant 0 : index
    %9 = vector.load %arg6[%c0_7, %c0_8] : memref<1x128xf32, #tpu.memory_space<vmem>>, vector<1x128xf32>
    %c0_9 = arith.constant 0 : index
    %c0_10 = arith.constant 0 : index
    %10 = vector.load %arg7[%c0_9, %c0_10] : memref<1x128xf32, #tpu.memory_space<vmem>>, vector<1x128xf32>
    %c0_11 = arith.constant 0 : index
    %c0_12 = arith.constant 0 : index
    %11 = vector.load %arg5[%c0_11, %c0_12] : memref<1x128xf32, #tpu.memory_space<vmem>>, vector<1x128xf32>
    %12 = arith.mulf %10, %11 : vector<1x128xf32>
    %13 = arith.addf %9, %12 : vector<1x128xf32>
    %c0_13 = arith.constant 0 : index
    %c0_14 = arith.constant 0 : index
    %14 = vector.load %arg1[%c0_13, %c0_14] : memref<8x128xf32, #tpu.memory_space<vmem>>, vector<8x128xf32>
    %15 = arith.truncf %14 : vector<8x128xf32> to vector<8x128xbf16>
    %16 = arith.truncf %8 : vector<128x128xf32> to vector<128x128xbf16>
    %cst = arith.constant dense<0.000000e+00> : vector<8x128xf32>
    %17 = tpu.matmul %15, %16, %cst {dimension_numbers = #tpu.dot_dimension_numbers<[1], [0], [0], [1], [0, 0, 1, 1], [], []>} : vector<8x128xbf16>, vector<128x128xbf16>, vector<8x128xf32> -> vector<8x128xf32>
    %18 = vector.broadcast %13 : vector<1x128xf32> to vector<8x128xf32>
    %19 = arith.addf %17, %18 : vector<8x128xf32>
    %c0_15 = arith.constant 0 : index
    %c0_16 = arith.constant 0 : index
    %20 = vector.load %arg8[%c0_15, %c0_16] : memref<8x128xf32, #tpu.memory_space<vmem>>, vector<8x128xf32>
    tpu.vector_store %arg8[%c0_15, %c0_16], %19 {strides = array<i32>} : memref<8x128xf32, #tpu.memory_space<vmem>>, vector<8x128xf32>,
    return
  }
  func.func @transform_0(%arg0: i32) -> (i32, i32) {
    %c0_i32 = arith.constant 0 : i32
    %c0_i32_0 = arith.constant 0 : i32
    %c0_i32_1 = arith.constant 0 : i32
    return %c0_i32, %c0_i32_0 : i32, i32
  }
  func.func @transform_1(%arg0: i32) -> (i32, i32) {
    %c0_i32 = arith.constant 0 : i32
    %c0_i32_0 = arith.constant 0 : i32
    return %c0_i32, %arg0 : i32, i32
  }
  func.func @transform_2(%arg0: i32) -> (i32, i32) {
    %c0_i32 = arith.constant 0 : i32
    %c0_i32_0 = arith.constant 0 : i32
    return %c0_i32, %arg0 : i32, i32
  }
  func.func @transform_3(%arg0: i32) -> (i32, i32) {
    %c0_i32 = arith.constant 0 : i32
    %c0_i32_0 = arith.constant 0 : i32
    %c0_i32_1 = arith.constant 0 : i32
    return %c0_i32, %c0_i32_0 : i32, i32
  }
  func.func @transform_4(%arg0: i32) -> (i32, i32) {
    %c0_i32 = arith.constant 0 : i32
    %c0_i32_0 = arith.constant 0 : i32
    return %c0_i32, %arg0 : i32, i32
  }
  func.func @transform_5(%arg0: i32) -> (i32, i32) {
    %c0_i32 = arith.constant 0 : i32
    %c0_i32_0 = arith.constant 0 : i32
    return %c0_i32, %arg0 : i32, i32
  }
  func.func @transform_6(%arg0: i32) -> (i32, i32) {
    %c0_i32 = arith.constant 0 : i32
    %c0_i32_0 = arith.constant 0 : i32
    return %c0_i32, %arg0 : i32, i32
  }
  func.func @transform_7(%arg0: i32) -> (i32, i32) {
    %c0_i32 = arith.constant 0 : i32
    %c0_i32_0 = arith.constant 0 : i32
    return %c0_i32, %arg0 : i32, i32
  }
}

</mosaic_0001>

<bundles_post_ra>
// kernel: tpu_custom_call.1
= control target key start
LH: loop header
LB: loop body
LE: loop exit
PB: predicated region body
PF: predicated region fallthrough
CT: control target
= control target key end

     0   :  { %12 = vsyncpa [#allocation3], 0  ;;  %s611_s0 = inlined_call_operand.hbm [shape: f32[8,128], index: 0, kind: input, shape index: {}]   ;;  %s612_s1 = inlined_call_operand.vmem [shape: f32[128,128], index: 1, kind: input, shape index: {}]   ;;  %s613_s2 = inlined_call_operand.hbm [shape: f32[128,128], index: 2, kind: input, shape index: {}]   ;;  %s614_s3 = inlined_call_operand.vmem [shape: f32[128,1], index: 3, kind: input, shape index: {}]   ;;  %s615_s4 = inlined_call_operand.vmem [shape: f32[1,128], index: 4, kind: input, shape index: {}]   ;;  %s616_s5 = inlined_call_operand.vmem [shape: f32[1,128], index: 5, kind: input, shape index: {}]   ;;  %s617_s6 = inlined_call_operand.vmem [shape: f32[1,128], index: 6, kind: input, shape index: {}]   ;;  %s618_s7 = inlined_call_operand.hbm [shape: f32[8,128], index: 7, kind: output, shape index: {}]  }
   0x1   :  { %13 = vsyncpa [#allocation6], 0 }
   0x2   :  { %14 = vsyncpa [#allocation4], 0  ;;  %s419_s24 = smov [#allocation2]   ;;  %s420_s26 = smov [#allocation5]  }
   0x3   :  { %s21_s25 = sshll.u32 %s419_s24, 4  ;;  %s32_s27 = sshll.u32 %s420_s26, 4  ;;  %s22_s25 = int_to_ptr.vmem [resolvable:$true] %s21_s25  ;;  %s33_s27 = int_to_ptr.vmem [resolvable:$true] %s32_s27 }
   0x4   :  { %s361_s28 = scalar_lea.vmem %s22_s25, 128  ;;  %p366_p1 = scmp.lt.s32.totalorder %s22_s25, %s22_s25 }
   0x5   :  { %p362_p0 = scmp.ne.s32.totalorder %s22_s25, %s361_s28  ;;  %p367_p2 = scmp.lt.s32.totalorder %s361_s28, %s361_s28 }
   0x7   :  { %p368_p3 = por %p367_p2, %p366_p1 }
   0x9   :  { %p369_p4 = pnand %p368_p3, %p362_p0 }
   0xb   :  { %372 = shalt.err (!%p369_p4)
}
   0xc   :  { %24 = dma.hbm_to_vmem [thread:$0]  %s611_s0, 128, %s22_s25, [#allocation3]  }
   0xd   :  { %s381_s8 = scalar_lea.vmem %s33_s27, 2048  ;;  %p386_p6 = scmp.lt.s32.totalorder %s33_s27, %s33_s27 }
   0xe   :  { %p382_p5 = scmp.ne.s32.totalorder %s33_s27, %s381_s8  ;;  %p387_p7 = scmp.lt.s32.totalorder %s381_s8, %s381_s8 }
  0x10   :  { %p388_p8 = por %p387_p7, %p386_p6 }
  0x12   :  { %p389_p9 = pnand %p388_p8, %p382_p5 }
  0x14   :  { %392 = shalt.err (!%p389_p9)
}
  0x15   :  { %s421_s9 = smov 128   ;;  %s422_s10 = smov 8  }
  0x16   :  { %38 = dma.hbm_to_vmem [thread:$0]  %s613_s2, 2048, %s33_s27, [#allocation6], %s421_s9, %s421_s9, %s422_s10  }
  0x17   :  { %413 = dma.done.wait [#allocation3], 128  }
  0x18   :  { %414 = vsyncadd [#allocation3], 4294967168 }
  0x19   :  { %415 = dma.done.wait [#allocation6], 2048  }
  0x1a   :  { %416 = vsyncadd [#allocation6], 4294965248  ;;  %v423_v0 = vmov 0   ;;  %v100_v1 = vld [vmem:[%s614_s3 + $0x70] sm:$0xff]  ;;  %v98_v2 = vld [vmem:[%s614_s3 + $0x60] sm:$0xff]  ;;  %v424_v7 = vmov 0.0   ;;  %v184_v18 = vlaneseq }
  0x1b   :  { %352 = vset.pattern.permute.xlu1 %v423_v0  ;;  %351 = vset.pattern.permute.xlu0 %v423_v0  ;;  %v101_v3 = vld [vmem:[%s614_s3 + $0x78] sm:$0xff]  ;;  %v99_v4 = vld [vmem:[%s614_s3 + $0x68] sm:$0xff]  ;;  %v96_v6 = vld [vmem:[%s614_s3 + $0x50] sm:$0xff]  ;;  %vm425_vm0 = vmmov 0  }
  0x1c   :  { %175 = vperm.xlu0 %351, %v100_v1   ;;  %165 = vperm.xlu1 %352, %v98_v2   ;;  %v97_v5 = vld [vmem:[%s614_s3 + $0x58] sm:$0xff]  ;;  %v95_v8 = vld [vmem:[%s614_s3 + $0x48] sm:$0xff]  ;;  %v94_v9 = vld [vmem:[%s614_s3 + $0x40] sm:$0xff]  ;;  %v185_v19 = vshrl.u32 %v184_v18, 7 }
  0x1d   :  { %323 = vmatprep.subr.bf16.mxu0 %v424_v7  ;;  %v93_v10 = vld [vmem:[%s614_s3 + $0x38] sm:$0xff]  ;;  %v92_v11 = vld [vmem:[%s614_s3 + $0x30] sm:$0xff]  ;;  %v91_v12 = vld [vmem:[%s614_s3 + $0x28] sm:$0xff]  ;;  %339 = vmatprep.mubr.msk.bf16.mxu0 %vm425_vm0, %v424_v7 }
  0x1e   :  { %v90_v13 = vld [vmem:[%s614_s3 + $0x20] sm:$0xff]  ;;  %v89_v14 = vld [vmem:[%s614_s3 + $0x18] sm:$0xff]  ;;  %v88_v15 = vld [vmem:[%s614_s3 + $0x10] sm:$0xff]  ;;  %v186_v24 = vsub.s32 0, %v185_v19 }
  0x1f   :  { %v87_v16 = vld [vmem:[%s614_s3 + $0x8] sm:$0xff]  ;;  %v86_v17 = vld [vmem:[%s614_s3] sm:$0xff]  ;;  %v84_v31 = vld [vmem:[#allocation5 + $0x70] sm:$0xff] }
  0x20   :  { %180 = vperm.xlu0 %351, %v101_v3   ;;  %170 = vperm.xlu1 %352, %v99_v4   ;;  %v102_v20 = vld [vmem:[%s615_s4] sm:$0x1]  ;;  %v82_v33 = vld [vmem:[#allocation5 + $0x60] sm:$0xff]  ;;  %v83_v37 = vld [vmem:[#allocation5 + $0x68] sm:$0xff] }
  0x21   :  { %v237_v21 = vld [vmem:[%s616_s5] sm:$0x1]  ;;  %v534_v27 = vrot.slane %v102_v20, %v186_v24  ;;  %v68_v42 = vld [vmem:[%s612_s1 + $0x70] sm:$0xff]  ;;  %v69_v43 = vld [vmem:[%s612_s1 + $0x78] sm:$0xff] }
  0x22   :  { %v238_v22 = vld [vmem:[%s617_s6] sm:$0x1]  ;;  %v67_v46 = vld [vmem:[%s612_s1 + $0x68] sm:$0xff]  ;;  %v80_v51 = vld [vmem:[#allocation5 + $0x50] sm:$0xff]  ;;  %s426_s6 = smov [#allocation7]  }
  0x23   :  { %v239_v23 = vmul.f32 %v238_v22, %v102_v20  ;;  %v85_v35 = vld [vmem:[#allocation5 + $0x78] sm:$0xff]  ;;  %v65_v58 = vld [vmem:[%s612_s1 + $0x58] sm:$0xff]  ;;  %v64_v62 = vld [vmem:[%s612_s1 + $0x50] sm:$0xff]  ;;  %s304_s24 = sshll.u32 %s426_s6, 4  ;;  %s305_s24 = int_to_ptr.vmem [resolvable:$true] %s304_s24 }
  0x24   :  { %160 = vperm.xlu1 %352, %v97_v5   ;;  %155 = vperm.xlu0 %351, %v96_v6   ;;  %v66_v44 = vld [vmem:[%s612_s1 + $0x60] sm:$0xff]  ;;  %v79_v0 = vld [vmem:[#allocation5 + $0x48] sm:$0xff]  ;;  %v78_v2 = vld [vmem:[#allocation5 + $0x40] sm:$0xff]  ;;  %p398_p11 = scmp.lt.s32.totalorder %s305_s24, %s305_s24 }
  0x25   :  { %v240_v25 = vadd.f32 %v239_v23, %v237_v21  ;;  %v81_v49 = vld [vmem:[#allocation5 + $0x58] sm:$0xff]  ;;  %v61_v21 = vld [vmem:[%s612_s1 + $0x38] sm:$0xff] }
  0x27   :  { %v532_v26 = vrot.slane %v240_v25, %v186_v24  ;;  %v60_v25 = vld [vmem:[%s612_s1 + $0x30] sm:$0xff] }
  0x28   :  { %150 = vperm.xlu1 %352, %v95_v8   ;;  %145 = vperm.xlu0 %351, %v94_v9   ;;  %v63_v9 = vld [vmem:[%s612_s1 + $0x48] sm:$0xff] }
  0x2c   :  { %140 = vperm.xlu1 %352, %v93_v10   ;;  %135 = vperm.xlu0 %351, %v92_v11   ;;  %v62_v11 = vld [vmem:[%s612_s1 + $0x40] sm:$0xff] }
  0x30   :  { %130 = vperm.xlu1 %352, %v91_v12   ;;  %125 = vperm.xlu0 %351, %v90_v13  }
  0x34   :  { %120 = vperm.xlu1 %352, %v89_v14   ;;  %115 = vperm.xlu0 %351, %v88_v15   ;;  %v77_v14 = vld [vmem:[#allocation5 + $0x38] sm:$0xff] }
  0x38   :  { %110 = vperm.xlu1 %352, %v87_v16   ;;  %105 = vperm.xlu0 %351, %v86_v17   ;;  %v76_v16 = vld [vmem:[#allocation5 + $0x30] sm:$0xff] }
  0x97   :  { %v176_v28 = vpop.permute.xlu0 %175  ;;  %v166_v29 = vpop.permute.xlu1 %165 }
  0x98   :  { %v203_v30 = vmul.f32 %v534_v27, %v176_v28  ;;  %v201_v32 = vmul.f32 %v534_v27, %v166_v29  ;;  %v75_v29 = vld [vmem:[#allocation5 + $0x28] sm:$0xff] }
  0x9a   :  { %v219_v38 = vmul.f32 %v203_v30, %v84_v31  ;;  %v217_v41 = vmul.f32 %v201_v32, %v82_v33  ;;  %v74_v31 = vld [vmem:[#allocation5 + $0x20] sm:$0xff] }
  0x9b   :  { %v181_v34 = vpop.permute.xlu0 %180  ;;  %v171_v36 = vpop.permute.xlu1 %170 }
  0x9c   :  { %v204_v39 = vmul.f32 %v534_v27, %v181_v34  ;;  %v202_v40 = vmul.f32 %v534_v27, %v171_v36  ;;  %v235_v54 = vadd.f32 %v219_v38, %v68_v42  ;;  %v233_v56 = vadd.f32 %v217_v41, %v66_v44  ;;  %v73_v42 = vld [vmem:[#allocation5 + $0x18] sm:$0xff]  ;;  %v72_v44 = vld [vmem:[#allocation5 + $0x10] sm:$0xff] }
  0x9e   :  { %v220_v45 = vmul.f32 %v204_v39, %v85_v35  ;;  %v218_v47 = vmul.f32 %v202_v40, %v83_v37  ;;  %v59_v37 = vld [vmem:[%s612_s1 + $0x28] sm:$0xff]  ;;  %v58_v39 = vld [vmem:[%s612_s1 + $0x20] sm:$0xff] }
  0x9f   :  { %v161_v48 = vpop.permute.xlu1 %160  ;;  %v156_v50 = vpop.permute.xlu0 %155 }
  0xa0   :  { %v200_v52 = vmul.f32 %v534_v27, %v161_v48  ;;  %v199_v53 = vmul.f32 %v534_v27, %v156_v50  ;;  %v236_v55 = vadd.f32 %v220_v45, %v69_v43  ;;  %v234_v57 = vadd.f32 %v218_v47, %v67_v46 }
  0xa2   :  { %v216_v59 = vmul.f32 %v200_v52, %v81_v49  ;;  %v215_v60 = vmul.f32 %v199_v53, %v80_v51  ;;  %v250_v61 = vpack.c.bf16 %v236_v55, %v235_v54  ;;  %v249_v5 = vpack.c.bf16 %v234_v57, %v233_v56  ;;  %v57_v49 = vld [vmem:[%s612_s1 + $0x18] sm:$0xff]  ;;  %v56_v53 = vld [vmem:[%s612_s1 + $0x10] sm:$0xff]  ;;  %v70_v57 = vld [vmem:[#allocation5] sm:$0xff] }
  0xa3   :  { %v151_v63 = vpop.permute.xlu1 %150  ;;  %v146_v1 = vpop.permute.xlu0 %145  ;;  %v71_v55 = vld [vmem:[#allocation5 + $0x8] sm:$0xff] }
  0xa4   :  { %v198_v3 = vmul.f32 %v534_v27, %v151_v63  ;;  %v197_v4 = vmul.f32 %v534_v27, %v146_v1  ;;  %324 = vmatpush3.bf16.msra.mxu0 %v250_v61  ;;  %v232_v6 = vadd.f32 %v216_v59, %v65_v58  ;;  %v231_v8 = vadd.f32 %v215_v60, %v64_v62  ;;  %v55_v1 = vld [vmem:[%s612_s1 + $0x8] sm:$0xff] }
  0xa5   :  { %325 = vmatprep.subr.bf16.mxu0 %v424_v7 }
  0xa6   :  { %v214_v10 = vmul.f32 %v198_v3, %v79_v0  ;;  %v213_v12 = vmul.f32 %v197_v4, %v78_v2  ;;  %v248_v24 = vpack.c.bf16 %v232_v6, %v231_v8  ;;  %v54_v2 = vld [vmem:[%s612_s1] sm:$0xff]  ;;  %s393_s1 = scalar_lea.vmem %s305_s24, 128 }
  0xa7   :  { %v141_v13 = vpop.permute.xlu1 %140  ;;  %v136_v15 = vpop.permute.xlu0 %135  ;;  %p394_p10 = scmp.ne.s32.totalorder %s305_s24, %s393_s1  ;;  %p399_p12 = scmp.lt.s32.totalorder %s393_s1, %s393_s1 }
  0xa8   :  { %v196_v17 = vmul.f32 %v534_v27, %v141_v13  ;;  %v195_v18 = vmul.f32 %v534_v27, %v136_v15  ;;  %326 = vmatpush3.bf16.msra.mxu0 %v249_v5  ;;  %v230_v19 = vadd.f32 %v214_v10, %v63_v9  ;;  %v229_v20 = vadd.f32 %v213_v12, %v62_v11  ;;  %v241_v5 = vld [vmem:[#allocation2] sm:$0xff] }
  0xa9   :  { %327 = vmatprep.subr.bf16.mxu0 %v424_v7  ;;  %v242_v8 = vpack.c.bf16 %v241_v5, %v241_v5  ;;  %p400_p13 = por %p399_p12, %p398_p11 }
  0xaa   :  { %v212_v22 = vmul.f32 %v196_v17, %v77_v14  ;;  %v211_v23 = vmul.f32 %v195_v18, %v76_v16  ;;  %v247_v34 = vpack.c.bf16 %v230_v19, %v229_v20 }
  0xab   :  { %v131_v28 = vpop.permute.xlu1 %130  ;;  %v126_v30 = vpop.permute.xlu0 %125  ;;  %p401_p0 = pnand %p400_p13, %p394_p10 }
  0xac   :  { %v194_v32 = vmul.f32 %v534_v27, %v131_v28  ;;  %v193_v33 = vmul.f32 %v534_v27, %v126_v30  ;;  %328 = vmatpush3.bf16.msra.mxu0 %v248_v24  ;;  %v228_v35 = vadd.f32 %v212_v22, %v61_v21  ;;  %v227_v36 = vadd.f32 %v211_v23, %v60_v25 }
  0xad   :  { %329 = vmatprep.subr.bf16.mxu0 %v424_v7 }
  0xae   :  { %v210_v38 = vmul.f32 %v194_v32, %v75_v29  ;;  %v209_v40 = vmul.f32 %v193_v33, %v74_v31  ;;  %v246_v52 = vpack.c.bf16 %v228_v35, %v227_v36 }
  0xaf   :  { %v121_v41 = vpop.permute.xlu1 %120  ;;  %v116_v43 = vpop.permute.xlu0 %115 }
  0xb0   :  { %v192_v45 = vmul.f32 %v534_v27, %v121_v41  ;;  %v191_v46 = vmul.f32 %v534_v27, %v116_v43  ;;  %330 = vmatpush3.bf16.msra.mxu0 %v247_v34  ;;  %v226_v47 = vadd.f32 %v210_v38, %v59_v37  ;;  %v225_v48 = vadd.f32 %v209_v40, %v58_v39 }
  0xb1   :  { %331 = vmatprep.subr.bf16.mxu0 %v424_v7 }
  0xb2   :  { %v208_v50 = vmul.f32 %v192_v45, %v73_v42  ;;  %v207_v51 = vmul.f32 %v191_v46, %v72_v44  ;;  %v245_v60 = vpack.c.bf16 %v226_v47, %v225_v48 }
  0xb3   :  { %v111_v54 = vpop.permute.xlu1 %110  ;;  %v106_v56 = vpop.permute.xlu0 %105 }
  0xb4   :  { %v190_v58 = vmul.f32 %v534_v27, %v111_v54  ;;  %v189_v59 = vmul.f32 %v534_v27, %v106_v56  ;;  %332 = vmatpush3.bf16.msra.mxu0 %v246_v52  ;;  %v224_v61 = vadd.f32 %v208_v50, %v57_v49  ;;  %v223_v62 = vadd.f32 %v207_v51, %v56_v53 }
  0xb5   :  { %333 = vmatprep.subr.bf16.mxu0 %v424_v7 }
  0xb6   :  { %v206_v63 = vmul.f32 %v190_v58, %v71_v55  ;;  %v205_v0 = vmul.f32 %v189_v59, %v70_v57  ;;  %v244_v4 = vpack.c.bf16 %v224_v61, %v223_v62 }
  0xb8   :  { %334 = vmatpush3.bf16.msra.mxu0 %v245_v60  ;;  %v222_v27 = vadd.f32 %v206_v63, %v55_v1  ;;  %v221_v3 = vadd.f32 %v205_v0, %v54_v2 }
  0xb9   :  { %335 = vmatprep.subr.bf16.mxu0 %v424_v7 }
  0xba   :  { %v243_v6 = vpack.c.bf16 %v222_v27, %v221_v3 }
  0xbc   :  { %336 = vmatpush3.bf16.msra.mxu0 %v244_v4 }
  0xbd   :  { %337 = vmatprep.subr.bf16.mxu0 %v424_v7 }
  0xc0   :  { %338 = vmatpush3.bf16.msra.mxu0 %v243_v6 }
  0xc3   :  { %340 = vmatmul.mubr.bf16.vlgmr.msra.gmra.mxu0 %v242_v8 }
 0x183   :  { %v291_v9 = vpop.f32.mrf.mxu0 }
 0x184   :  { %v292_v10 = vadd.f32 %v291_v9, %v532_v26 }
 0x185   :  { %v341_v11 = vpop.f32.mrf.mxu0 }
 0x186   :  { %297 = vst [vmem:[#allocation7] sm:$0xff] %v292_v10 }
 0x187   :  { %v294_v12 = vpop.f32.mrf.mxu0 }
 0x188   :  { %404 = shalt.err (!%p401_p0)
}
 0x189   :  { %307 = dma.vmem_to_hbm [thread:$0]  %s305_s24, 128, %s618_s7, [#allocation4]   ;;  %v342_v7 = vpop.f32.mrf.mxu0 }
 0x18a   :  { %417 = dma.done.wait [#allocation4], 128  }
 0x18b   :  { %418 = vsyncadd [#allocation4], 4294967168 }
 0x18c   :  { %311 = vsyncpa [#allocation3], 1 }
 0x18d   :  { %312 = vsyncpa [#allocation6], 1 }
 0x18e   :  { %313 = vsyncpa [#allocation4], 1 }

</bundles_post_ra>
